<compile_context>
chip_gen: v6e
topology: v6e:2x2x1
jax: 0.10.0
libtpu: 0.0.40
codegen_flags: <defaults>
</compile_context>

<pallas_src>
import jax
import jax.numpy as jnp
from jax import lax
from jax.experimental import pallas as pl
from jax.experimental.pallas import tpu as pltpu


# ----------------------------------------------------------------------------
# Kernel 1: hoisted, K-tiled input projection   gates_x = X @ W_ih + b
#   X: (M, F) fp32 (M = B*T), W_ih: (F, 4H) bf16, b: (1, 4H) fp32
# ----------------------------------------------------------------------------
def input_proj_kernel(x_ref, w_ref, b_ref, out_ref, acc_ref):
    k = pl.program_id(0)

    @pl.when(k == 0)
    def _():
        acc_ref[...] = jnp.zeros_like(acc_ref)

    acc_ref[...] += jnp.dot(
        x_ref[...].astype(jnp.bfloat16), w_ref[...],
        preferred_element_type=jnp.float32)

    @pl.when(k == pl.num_programs(0) - 1)
    def _():
        out_ref[...] = acc_ref[...] + b_ref[...]


def input_projection(x_flat, w_ih, b, tk_max=2048):
    """(M, F) @ (F, 4H) + b -> (M, 4H) fp32, streaming W_ih in K tiles."""
    M, F = x_flat.shape
    G = w_ih.shape[1]                     # 4H
    tk = min(F, tk_max)
    rem = F % tk
    if rem:                               # zero-pad K so tiles divide evenly
        pad = tk - rem
        x_flat = jnp.pad(x_flat, ((0, 0), (0, pad)))
        w_ih = jnp.pad(w_ih, ((0, pad), (0, 0)))
        F += pad
    nk = F // tk

    return pl.pallas_call(
        input_proj_kernel,
        out_shape=jax.ShapeDtypeStruct((M, G), jnp.float32),
        grid_spec=pltpu.PrefetchScalarGridSpec(
            num_scalar_prefetch=0,
            grid=(nk,),
            in_specs=[
                pl.BlockSpec((M, tk), lambda k: (0, k)),
                pl.BlockSpec((tk, G), lambda k: (k, 0)),
                pl.BlockSpec((1, G), lambda k: (0, 0)),
            ],
            out_specs=pl.BlockSpec((M, G), lambda k: (0, 0)),
            scratch_shapes=[pltpu.VMEM((M, G), jnp.float32)],
        ),
        compiler_params=pltpu.CompilerParams(
            dimension_semantics=("arbitrary",)),
    )(x_flat, w_ih, b)


# ----------------------------------------------------------------------------
# Kernel 2: fused LSTM recurrences (audio + video) + projections + common MLP
#           + predict head.  No grid: time handled by in-kernel fori_loop over
#           the VMEM-resident gates buffers.
# ----------------------------------------------------------------------------
def _lstm_scan(gates_ref, w_hh, B, H, T):
    """Run the LSTM recurrence over a (T, B, 4H) VMEM gates buffer."""
    def step(t, carry):
        h, c = carry
        g = gates_ref[t] + jnp.dot(h, w_hh, preferred_element_type=jnp.float32)
        # PyTorch LSTM gate order: i, f, g, o
        i_g = jax.nn.sigmoid(g[:, 0 * H:1 * H])
        f_g = jax.nn.sigmoid(g[:, 1 * H:2 * H])
        g_g = jnp.tanh(g[:, 2 * H:3 * H])
        o_g = jax.nn.sigmoid(g[:, 3 * H:4 * H])
        c_new = f_g * c + i_g * g_g
        h_new = o_g * jnp.tanh(c_new)
        return (h_new, c_new)

    h0 = jnp.zeros((B, H), jnp.float32)
    c0 = jnp.zeros((B, H), jnp.float32)
    h, _ = lax.fori_loop(0, T, step, (h0, c0))
    return h


def fused_recurrence_head_kernel(
        ga_ref, gv_ref,
        a_whh_ref, a_wproj_ref, a_bproj_ref,
        v_whh_ref, v_wproj_ref, v_bproj_ref,
        c_w1_ref, c_b1_ref, c_w2_ref, c_b2_ref,
        p_w1v_ref, p_w1a_ref, p_b1_ref,
        p_w2_ref, p_b2_ref, p_w3_ref, p_b3_ref,
        out_ref):
    T_a, B, G = ga_ref.shape
    T_v = gv_ref.shape[0]
    H = G // 4

    h_a = _lstm_scan(ga_ref, a_whh_ref[...], B, H, T_a)
    h_v = _lstm_scan(gv_ref, v_whh_ref[...], B, H, T_v)

    a_enc = (jnp.dot(h_a, a_wproj_ref[...], preferred_element_type=jnp.float32)
             + a_bproj_ref[...])
    v_enc = (jnp.dot(h_v, v_wproj_ref[...], preferred_element_type=jnp.float32)
             + v_bproj_ref[...])

    def common(x):
        x = jnp.maximum(x, 0.0)
        x = jnp.dot(x, c_w1_ref[...], preferred_element_type=jnp.float32) + c_b1_ref[...]
        x = jnp.maximum(x, 0.0)
        x = jnp.dot(x, c_w2_ref[...], preferred_element_type=jnp.float32) + c_b2_ref[...]
        return x

    a_out = common(a_enc)
    v_out = common(v_enc)

    # cat((video_out, audio_out), 1) @ Wp1 == v_out @ Wp1[:D] + a_out @ Wp1[D:]
    h = (jnp.dot(v_out, p_w1v_ref[...], preferred_element_type=jnp.float32)
         + jnp.dot(a_out, p_w1a_ref[...], preferred_element_type=jnp.float32)
         + p_b1_ref[...])
    h = jnp.maximum(h, 0.0)
    h = jnp.dot(h, p_w2_ref[...], preferred_element_type=jnp.float32) + p_b2_ref[...]
    h = jnp.maximum(h, 0.0)
    h = jnp.dot(h, p_w3_ref[...], preferred_element_type=jnp.float32) + p_b3_ref[...]
    out_ref[...] = jax.nn.sigmoid(h)


def fused_recurrence_head(ga_t, gv_t, p):
    B = ga_t.shape[1]
    args = (ga_t, gv_t,
            p["a_w_hh"], p["a_w_proj"], p["a_b_proj"],
            p["v_w_hh"], p["v_w_proj"], p["v_b_proj"],
            p["c_w1"], p["c_b1"], p["c_w2"], p["c_b2"],
            p["p_w1v"], p["p_w1a"], p["p_b1"],
            p["p_w2"], p["p_b2"], p["p_w3"], p["p_b3"])
    return pl.pallas_call(
        fused_recurrence_head_kernel,
        out_shape=jax.ShapeDtypeStruct((B, 1), jnp.float32),
        in_specs=[pl.BlockSpec(memory_space=pltpu.MemorySpace.VMEM)
                  for _ in args],
        out_specs=pl.BlockSpec(memory_space=pltpu.MemorySpace.VMEM),
    )(*args)


# ----------------------------------------------------------------------------
# Parameters (deterministic) and full forward (bce path).
# ----------------------------------------------------------------------------
def make_params(key, audio_feat, video_feat, hidden, out_dim):
    ks = jax.random.split(key, 20)
    s = 0.1

    def n(k, shape):
        return jax.random.normal(k, shape, dtype=jnp.float32) * s

    D, H = out_dim, hidden
    return {
        # audio LSTM encoder (W_ih kept bf16 for the hoisted MXU projection)
        "a_w_ih": n(ks[0], (audio_feat, 4 * H)).astype(jnp.bfloat16),
        "a_w_hh": n(ks[1], (H, 4 * H)),
        "a_b":    n(ks[2], (1, 4 * H)),          # combined bias_ih + bias_hh
        "a_w_proj": n(ks[3], (H, D)),
        "a_b_proj": n(ks[4], (1, D)),
        # video LSTM encoder
        "v_w_ih": n(ks[5], (video_feat, 4 * H)).astype(jnp.bfloat16),
        "v_w_hh": n(ks[6], (H, 4 * H)),
        "v_b":    n(ks[7], (1, 4 * H)),
        "v_w_proj": n(ks[8], (H, D)),
        "v_b_proj": n(ks[9], (1, D)),
        # common MLP (shared between modalities, as in the PyTorch module)
        "c_w1": n(ks[10], (D, D)), "c_b1": n(ks[11], (1, D)),
        "c_w2": n(ks[12], (D, D)), "c_b2": n(ks[13], (1, D)),
        # predict MLP; first linear split into video / audio halves of cat input
        "p_w1v": n(ks[14], (D, D)), "p_w1a": n(ks[15], (D, D)),
        "p_b1": n(ks[16], (1, D)),
        "p_w2": n(ks[17], (D, D // 2)), "p_b2": n(ks[18], (1, D // 2)),
        "p_w3": n(ks[19], (D // 2, 1)),
        "p_b3": jnp.zeros((1, 1), jnp.float32),
    }


@jax.jit
def model_forward_bce(audio, video, params):
    B, F_a, T_a = audio.shape
    Bv, T_v, Hh, Ww = video.shape
    F_v = Hh * Ww

    # Audio natural layout (B, F_a, T_a): small transpose -> (B*T_a, F_a).
    a_flat = jnp.transpose(audio.astype(jnp.float32), (0, 2, 1)).reshape(B * T_a, F_a)
    # Video natural layout (B, T_v, H, W): pure reshape (no big transpose).
    v_flat = video.astype(jnp.float32).reshape(Bv * T_v, F_v)

    # Hoisted input projections (one MXU-shaped matmul per modality).
    ga = input_projection(a_flat, params["a_w_ih"], params["a_b"])   # (B*T_a, 4H)
    gv = input_projection(v_flat, params["v_w_ih"], params["v_b"])   # (B*T_v, 4H)

    G = ga.shape[1]
    # Only the small gate tensors are reordered to time-major for the recurrence.
    ga_t = jnp.transpose(ga.reshape(B, T_a, G), (1, 0, 2))           # (T_a, B, 4H)
    gv_t = jnp.transpose(gv.reshape(Bv, T_v, G), (1, 0, 2))          # (T_v, B, 4H)

    pred = fused_recurrence_head(ga_t, gv_t, params)
    return pred, None


if __name__ == "__main__":
    B = 2
    A_F, A_T = 16, 8          # small stand-in for the (257, 690) spectrogram
    V_T, V_H, V_W = 8, 8, 8   # small stand-in for the (48, 360, 360) video
    HIDDEN = 32
    OUT_DIM = 32

    key = jax.random.PRNGKey(0)
    k_a, k_v, k_p = jax.random.split(key, 3)

    audio = jax.random.normal(k_a, (B, A_F, A_T), dtype=jnp.float32)
    video = jax.random.normal(k_v, (B, V_T, V_H, V_W), dtype=jnp.float32)
    params = make_params(k_p, audio_feat=A_F, video_feat=V_H * V_W,
                         hidden=HIDDEN, out_dim=OUT_DIM)

    pred, _ = model_forward_bce(audio, video, params)
    pred = jax.block_until_ready(pred)
    assert pred.shape == (B, 1)
    assert bool(jnp.all(jnp.isfinite(pred)))
    assert bool(jnp.all((pred >= 0.0) & (pred <= 1.0)))
    print("KERNEL_OK")
</pallas_src>

<mosaic_0001>
module attributes {stable_mosaic.version = 11 : i64} {
  func.func @input_proj_kernel(%arg0: i32, %arg1: memref<16x64xf32, #tpu.memory_space<vmem>>, %arg2: memref<64x128xbf16, #tpu.memory_space<vmem>>, %arg3: memref<1x128xf32, #tpu.memory_space<vmem>>, %arg4: memref<16x128xf32, #tpu.memory_space<vmem>>, %arg5: memref<16x128xf32, #tpu.memory_space<vmem>>) attributes {dimension_semantics = [#tpu.dimension_semantics<arbitrary>], iteration_bounds = array<i64: 1>, scalar_prefetch = 0 : i64, scratch_operands = 1 : i64, tpu.core_type = #tpu.core_type<tc>, window_params = [{transform_indices = @transform_0, window_bounds = array<i64: 16, 64>}, {transform_indices = @transform_1, window_bounds = array<i64: 64, 128>}, {pipeline_mode = #tpu.pipeline_mode<synchronous>, transform_indices = @transform_2, window_bounds = array<i64: 1, 128>}, {pipeline_mode = #tpu.pipeline_mode<synchronous>, transform_indices = @transform_3, window_bounds = array<i64: 16, 128>}]} {
    %c0_i32 = arith.constant 0 : i32
    %0 = arith.cmpi eq, %arg0, %c0_i32 : i32
    %1 = arith.extui %0 : i1 to i32
    %c0_i32_0 = arith.constant 0 : i32
    %2 = arith.cmpi ne, %1, %c0_i32_0 : i32
    scf.if %2 {
      %cst_10 = arith.constant 0.000000e+00 : f32
      %13 = vector.broadcast %cst_10 : f32 to vector<16x128xf32>
      %c0_11 = arith.constant 0 : index
      %c0_12 = arith.constant 0 : index
      %14 = vector.load %arg5[%c0_11, %c0_12] : memref<16x128xf32, #tpu.memory_space<vmem>>, vector<16x128xf32>
      tpu.vector_store %arg5[%c0_11, %c0_12], %13 {strides = array<i32>} : memref<16x128xf32, #tpu.memory_space<vmem>>, vector<16x128xf32>,
    } else {
    }
    %c0 = arith.constant 0 : index
    %c0_1 = arith.constant 0 : index
    %3 = vector.load %arg5[%c0, %c0_1] : memref<16x128xf32, #tpu.memory_space<vmem>>, vector<16x128xf32>
    %c0_2 = arith.constant 0 : index
    %c0_3 = arith.constant 0 : index
    %4 = vector.load %arg1[%c0_2, %c0_3] : memref<16x64xf32, #tpu.memory_space<vmem>>, vector<16x64xf32>
    %5 = arith.truncf %4 : vector<16x64xf32> to vector<16x64xbf16>
    %c0_4 = arith.constant 0 : index
    %c0_5 = arith.constant 0 : index
    %6 = vector.load %arg2[%c0_4, %c0_5] : memref<64x128xbf16, #tpu.memory_space<vmem>>, vector<64x128xbf16>
    %cst = arith.constant dense<0.000000e+00> : vector<16x128xf32>
    %7 = tpu.matmul %5, %6, %cst {dimension_numbers = #tpu.dot_dimension_numbers<[1], [0], [0], [1], [0, 0, 1, 1], [], []>} : vector<16x64xbf16>, vector<64x128xbf16>, vector<16x128xf32> -> vector<16x128xf32>
    %8 = arith.addf %3, %7 : vector<16x128xf32>
    %c0_6 = arith.constant 0 : index
    %c0_7 = arith.constant 0 : index
    %9 = vector.load %arg5[%c0_6, %c0_7] : memref<16x128xf32, #tpu.memory_space<vmem>>, vector<16x128xf32>
    tpu.vector_store %arg5[%c0_6, %c0_7], %8 {strides = array<i32>} : memref<16x128xf32, #tpu.memory_space<vmem>>, vector<16x128xf32>,
    %c0_i32_8 = arith.constant 0 : i32
    %10 = arith.cmpi eq, %arg0, %c0_i32_8 : i32
    %11 = arith.extui %10 : i1 to i32
    %c0_i32_9 = arith.constant 0 : i32
    %12 = arith.cmpi ne, %11, %c0_i32_9 : i32
    scf.if %12 {
      %c0_10 = arith.constant 0 : index
      %c0_11 = arith.constant 0 : index
      %13 = vector.load %arg5[%c0_10, %c0_11] : memref<16x128xf32, #tpu.memory_space<vmem>>, vector<16x128xf32>
      %c0_12 = arith.constant 0 : index
      %c0_13 = arith.constant 0 : index
      %14 = vector.load %arg3[%c0_12, %c0_13] : memref<1x128xf32, #tpu.memory_space<vmem>>, vector<1x128xf32>
      %15 = vector.broadcast %14 : vector<1x128xf32> to vector<16x128xf32>
      %16 = arith.addf %13, %15 : vector<16x128xf32>
      %c0_14 = arith.constant 0 : index
      %c0_15 = arith.constant 0 : index
      %17 = vector.load %arg4[%c0_14, %c0_15] : memref<16x128xf32, #tpu.memory_space<vmem>>, vector<16x128xf32>
      tpu.vector_store %arg4[%c0_14, %c0_15], %16 {strides = array<i32>} : memref<16x128xf32, #tpu.memory_space<vmem>>, vector<16x128xf32>,
    } else {
    }
    return
  }
  func.func @transform_0(%arg0: i32) -> (i32, i32) {
    %c0_i32 = arith.constant 0 : i32
    %c0_i32_0 = arith.constant 0 : i32
    return %c0_i32, %arg0 : i32, i32
  }
  func.func @transform_1(%arg0: i32) -> (i32, i32) {
    %c0_i32 = arith.constant 0 : i32
    %c0_i32_0 = arith.constant 0 : i32
    return %arg0, %c0_i32 : i32, i32
  }
  func.func @transform_2(%arg0: i32) -> (i32, i32) {
    %c0_i32 = arith.constant 0 : i32
    %c0_i32_0 = arith.constant 0 : i32
    %c0_i32_1 = arith.constant 0 : i32
    return %c0_i32, %c0_i32_0 : i32, i32
  }
  func.func @transform_3(%arg0: i32) -> (i32, i32) {
    %c0_i32 = arith.constant 0 : i32
    %c0_i32_0 = arith.constant 0 : i32
    %c0_i32_1 = arith.constant 0 : i32
    return %c0_i32, %c0_i32_0 : i32, i32
  }
}

module attributes {stable_mosaic.version = 11 : i64} {
  func.func @input_proj_kernel(%arg0: i32, %arg1: memref<16x16xf32, #tpu.memory_space<vmem>>, %arg2: memref<16x128xbf16, #tpu.memory_space<vmem>>, %arg3: memref<1x128xf32, #tpu.memory_space<vmem>>, %arg4: memref<16x128xf32, #tpu.memory_space<vmem>>, %arg5: memref<16x128xf32, #tpu.memory_space<vmem>>) attributes {dimension_semantics = [#tpu.dimension_semantics<arbitrary>], iteration_bounds = array<i64: 1>, scalar_prefetch = 0 : i64, scratch_operands = 1 : i64, tpu.core_type = #tpu.core_type<tc>, window_params = [{transform_indices = @transform_0, window_bounds = array<i64: 16, 16>}, {transform_indices = @transform_1, window_bounds = array<i64: 16, 128>}, {pipeline_mode = #tpu.pipeline_mode<synchronous>, transform_indices = @transform_2, window_bounds = array<i64: 1, 128>}, {pipeline_mode = #tpu.pipeline_mode<synchronous>, transform_indices = @transform_3, window_bounds = array<i64: 16, 128>}]} {
    %c0_i32 = arith.constant 0 : i32
    %0 = arith.cmpi eq, %arg0, %c0_i32 : i32
    %1 = arith.extui %0 : i1 to i32
    %c0_i32_0 = arith.constant 0 : i32
    %2 = arith.cmpi ne, %1, %c0_i32_0 : i32
    scf.if %2 {
      %cst_10 = arith.constant 0.000000e+00 : f32
      %13 = vector.broadcast %cst_10 : f32 to vector<16x128xf32>
      %c0_11 = arith.constant 0 : index
      %c0_12 = arith.constant 0 : index
      %14 = vector.load %arg5[%c0_11, %c0_12] : memref<16x128xf32, #tpu.memory_space<vmem>>, vector<16x128xf32>
      tpu.vector_store %arg5[%c0_11, %c0_12], %13 {strides = array<i32>} : memref<16x128xf32, #tpu.memory_space<vmem>>, vector<16x128xf32>,
    } else {
    }
    %c0 = arith.constant 0 : index
    %c0_1 = arith.constant 0 : index
    %3 = vector.load %arg5[%c0, %c0_1] : memref<16x128xf32, #tpu.memory_space<vmem>>, vector<16x128xf32>
    %c0_2 = arith.constant 0 : index
    %c0_3 = arith.constant 0 : index
    %4 = vector.load %arg1[%c0_2, %c0_3] : memref<16x16xf32, #tpu.memory_space<vmem>>, vector<16x16xf32>
    %5 = arith.truncf %4 : vector<16x16xf32> to vector<16x16xbf16>
    %c0_4 = arith.constant 0 : index
    %c0_5 = arith.constant 0 : index
    %6 = vector.load %arg2[%c0_4, %c0_5] : memref<16x128xbf16, #tpu.memory_space<vmem>>, vector<16x128xbf16>
    %cst = arith.constant dense<0.000000e+00> : vector<16x128xf32>
    %7 = tpu.matmul %5, %6, %cst {dimension_numbers = #tpu.dot_dimension_numbers<[1], [0], [0], [1], [0, 0, 1, 1], [], []>} : vector<16x16xbf16>, vector<16x128xbf16>, vector<16x128xf32> -> vector<16x128xf32>
    %8 = arith.addf %3, %7 : vector<16x128xf32>
    %c0_6 = arith.constant 0 : index
    %c0_7 = arith.constant 0 : index
    %9 = vector.load %arg5[%c0_6, %c0_7] : memref<16x128xf32, #tpu.memory_space<vmem>>, vector<16x128xf32>
    tpu.vector_store %arg5[%c0_6, %c0_7], %8 {strides = array<i32>} : memref<16x128xf32, #tpu.memory_space<vmem>>, vector<16x128xf32>,
    %c0_i32_8 = arith.constant 0 : i32
    %10 = arith.cmpi eq, %arg0, %c0_i32_8 : i32
    %11 = arith.extui %10 : i1 to i32
    %c0_i32_9 = arith.constant 0 : i32
    %12 = arith.cmpi ne, %11, %c0_i32_9 : i32
    scf.if %12 {
      %c0_10 = arith.constant 0 : index
      %c0_11 = arith.constant 0 : index
      %13 = vector.load %arg5[%c0_10, %c0_11] : memref<16x128xf32, #tpu.memory_space<vmem>>, vector<16x128xf32>
      %c0_12 = arith.constant 0 : index
      %c0_13 = arith.constant 0 : index
      %14 = vector.load %arg3[%c0_12, %c0_13] : memref<1x128xf32, #tpu.memory_space<vmem>>, vector<1x128xf32>
      %15 = vector.broadcast %14 : vector<1x128xf32> to vector<16x128xf32>
      %16 = arith.addf %13, %15 : vector<16x128xf32>
      %c0_14 = arith.constant 0 : index
      %c0_15 = arith.constant 0 : index
      %17 = vector.load %arg4[%c0_14, %c0_15] : memref<16x128xf32, #tpu.memory_space<vmem>>, vector<16x128xf32>
      tpu.vector_store %arg4[%c0_14, %c0_15], %16 {strides = array<i32>} : memref<16x128xf32, #tpu.memory_space<vmem>>, vector<16x128xf32>,
    } else {
    }
    return
  }
  func.func @transform_0(%arg0: i32) -> (i32, i32) {
    %c0_i32 = arith.constant 0 : i32
    %c0_i32_0 = arith.constant 0 : i32
    return %c0_i32, %arg0 : i32, i32
  }
  func.func @transform_1(%arg0: i32) -> (i32, i32) {
    %c0_i32 = arith.constant 0 : i32
    %c0_i32_0 = arith.constant 0 : i32
    return %arg0, %c0_i32 : i32, i32
  }
  func.func @transform_2(%arg0: i32) -> (i32, i32) {
    %c0_i32 = arith.constant 0 : i32
    %c0_i32_0 = arith.constant 0 : i32
    %c0_i32_1 = arith.constant 0 : i32
    return %c0_i32, %c0_i32_0 : i32, i32
  }
  func.func @transform_3(%arg0: i32) -> (i32, i32) {
    %c0_i32 = arith.constant 0 : i32
    %c0_i32_0 = arith.constant 0 : i32
    %c0_i32_1 = arith.constant 0 : i32
    return %c0_i32, %c0_i32_0 : i32, i32
  }
}

module attributes {stable_mosaic.version = 11 : i64} {
  func.func @fused_recurrence_head_kernel(%arg0: memref<8x2x128xf32, #tpu.memory_space<vmem>>, %arg1: memref<8x2x128xf32, #tpu.memory_space<vmem>>, %arg2: memref<32x128xf32, #tpu.memory_space<vmem>>, %arg3: memref<32x32xf32, #tpu.memory_space<vmem>>, %arg4: memref<1x32xf32, #tpu.memory_space<vmem>>, %arg5: memref<32x128xf32, #tpu.memory_space<vmem>>, %arg6: memref<32x32xf32, #tpu.memory_space<vmem>>, %arg7: memref<1x32xf32, #tpu.memory_space<vmem>>, %arg8: memref<32x32xf32, #tpu.memory_space<vmem>>, %arg9: memref<1x32xf32, #tpu.memory_space<vmem>>, %arg10: memref<32x32xf32, #tpu.memory_space<vmem>>, %arg11: memref<1x32xf32, #tpu.memory_space<vmem>>, %arg12: memref<32x32xf32, #tpu.memory_space<vmem>>, %arg13: memref<32x32xf32, #tpu.memory_space<vmem>>, %arg14: memref<1x32xf32, #tpu.memory_space<vmem>>, %arg15: memref<32x16xf32, #tpu.memory_space<vmem>>, %arg16: memref<1x16xf32, #tpu.memory_space<vmem>>, %arg17: memref<16x1xf32, #tpu.memory_space<vmem>>, %arg18: memref<1x1xf32, #tpu.memory_space<vmem>>, %arg19: memref<2x1xf32, #tpu.memory_space<vmem>>) attributes {dimension_semantics = [], scalar_prefetch = 0 : i64, scratch_operands = 0 : i64, tpu.core_type = #tpu.core_type<tc>} {
    %c0 = arith.constant 0 : index
    %c0_0 = arith.constant 0 : index
    %0 = vector.load %arg2[%c0, %c0_0] : memref<32x128xf32, #tpu.memory_space<vmem>>, vector<32x128xf32>
    %cst = arith.constant 0.000000e+00 : f32
    %1 = vector.broadcast %cst : f32 to vector<2x32xf32>
    %cst_1 = arith.constant 0.000000e+00 : f32
    %2 = vector.broadcast %cst_1 : f32 to vector<2x32xf32>
    %c0_i32 = arith.constant 0 : i32
    %c8_i32 = arith.constant 8 : i32
    %3 = arith.addi %c0_i32, %c8_i32 : i32
    %c1_i32 = arith.constant 1 : i32
    %4:2 = scf.for %arg20 = %c0_i32 to %3 step %c1_i32 iter_args(%arg21 = %1, %arg22 = %2) -> (vector<2x32xf32>, vector<2x32xf32>)  : i32 {
      %76 = arith.index_cast %arg20 : i32 to index
      %c0_68 = arith.constant 0 : index
      %c0_69 = arith.constant 0 : index
      %77 = vector.load %arg0[%76, %c0_68, %c0_69] : memref<8x2x128xf32, #tpu.memory_space<vmem>>, vector<1x2x128xf32>
      %78 = vector.shape_cast %77 : vector<1x2x128xf32> to vector<2x128xf32>
      %cst_70 = arith.constant dense<0.000000e+00> : vector<2x128xf32>
      %79 = tpu.matmul %arg21, %0, %cst_70 {dimension_numbers = #tpu.dot_dimension_numbers<[1], [0], [0], [1], [0, 0, 1, 1], [], []>} : vector<2x32xf32>, vector<32x128xf32>, vector<2x128xf32> -> vector<2x128xf32>
      %80 = arith.addf %78, %79 : vector<2x128xf32>
      %81 = vector.extract_strided_slice %80 {offsets = [0, 0], sizes = [2, 32], strides = [1, 1]} : vector<2x128xf32> to vector<2x32xf32>
      %82 = arith.negf %81 : vector<2x32xf32>
      %83 = math.exp %82 : vector<2x32xf32>
      %cst_71 = arith.constant 1.000000e+00 : f32
      %84 = vector.broadcast %cst_71 : f32 to vector<2x32xf32>
      %85 = arith.addf %84, %83 : vector<2x32xf32>
      %86 = arith.divf %84, %85 : vector<2x32xf32>
      %87 = vector.extract_strided_slice %80 {offsets = [0, 32], sizes = [2, 32], strides = [1, 1]} : vector<2x128xf32> to vector<2x32xf32>
      %88 = arith.negf %87 : vector<2x32xf32>
      %89 = math.exp %88 : vector<2x32xf32>
      %cst_72 = arith.constant 1.000000e+00 : f32
      %90 = vector.broadcast %cst_72 : f32 to vector<2x32xf32>
      %91 = arith.addf %90, %89 : vector<2x32xf32>
      %92 = arith.divf %90, %91 : vector<2x32xf32>
      %93 = vector.extract_strided_slice %80 {offsets = [0, 64], sizes = [2, 32], strides = [1, 1]} : vector<2x128xf32> to vector<2x32xf32>
      %94 = math.tanh %93 : vector<2x32xf32>
      %95 = vector.extract_strided_slice %80 {offsets = [0, 96], sizes = [2, 32], strides = [1, 1]} : vector<2x128xf32> to vector<2x32xf32>
      %96 = arith.negf %95 : vector<2x32xf32>
      %97 = math.exp %96 : vector<2x32xf32>
      %cst_73 = arith.constant 1.000000e+00 : f32
      %98 = vector.broadcast %cst_73 : f32 to vector<2x32xf32>
      %99 = arith.addf %98, %97 : vector<2x32xf32>
      %100 = arith.divf %98, %99 : vector<2x32xf32>
      %101 = arith.mulf %92, %arg22 : vector<2x32xf32>
      %102 = arith.mulf %86, %94 : vector<2x32xf32>
      %103 = arith.addf %101, %102 : vector<2x32xf32>
      %104 = math.tanh %103 : vector<2x32xf32>
      %105 = arith.mulf %100, %104 : vector<2x32xf32>
      scf.yield %105, %103 : vector<2x32xf32>, vector<2x32xf32>
    }
    %c8_i32_2 = arith.constant 8 : i32
    %c0_3 = arith.constant 0 : index
    %c0_4 = arith.constant 0 : index
    %5 = vector.load %arg5[%c0_3, %c0_4] : memref<32x128xf32, #tpu.memory_space<vmem>>, vector<32x128xf32>
    %cst_5 = arith.constant 0.000000e+00 : f32
    %6 = vector.broadcast %cst_5 : f32 to vector<2x32xf32>
    %cst_6 = arith.constant 0.000000e+00 : f32
    %7 = vector.broadcast %cst_6 : f32 to vector<2x32xf32>
    %c0_i32_7 = arith.constant 0 : i32
    %c8_i32_8 = arith.constant 8 : i32
    %8 = arith.addi %c0_i32_7, %c8_i32_8 : i32
    %c1_i32_9 = arith.constant 1 : i32
    %9:2 = scf.for %arg20 = %c0_i32_7 to %8 step %c1_i32_9 iter_args(%arg21 = %6, %arg22 = %7) -> (vector<2x32xf32>, vector<2x32xf32>)  : i32 {
      %76 = arith.index_cast %arg20 : i32 to index
      %c0_68 = arith.constant 0 : index
      %c0_69 = arith.constant 0 : index
      %77 = vector.load %arg1[%76, %c0_68, %c0_69] : memref<8x2x128xf32, #tpu.memory_space<vmem>>, vector<1x2x128xf32>
      %78 = vector.shape_cast %77 : vector<1x2x128xf32> to vector<2x128xf32>
      %cst_70 = arith.constant dense<0.000000e+00> : vector<2x128xf32>
      %79 = tpu.matmul %arg21, %5, %cst_70 {dimension_numbers = #tpu.dot_dimension_numbers<[1], [0], [0], [1], [0, 0, 1, 1], [], []>} : vector<2x32xf32>, vector<32x128xf32>, vector<2x128xf32> -> vector<2x128xf32>
      %80 = arith.addf %78, %79 : vector<2x128xf32>
      %81 = vector.extract_strided_slice %80 {offsets = [0, 0], sizes = [2, 32], strides = [1, 1]} : vector<2x128xf32> to vector<2x32xf32>
      %82 = arith.negf %81 : vector<2x32xf32>
      %83 = math.exp %82 : vector<2x32xf32>
      %cst_71 = arith.constant 1.000000e+00 : f32
      %84 = vector.broadcast %cst_71 : f32 to vector<2x32xf32>
      %85 = arith.addf %84, %83 : vector<2x32xf32>
      %86 = arith.divf %84, %85 : vector<2x32xf32>
      %87 = vector.extract_strided_slice %80 {offsets = [0, 32], sizes = [2, 32], strides = [1, 1]} : vector<2x128xf32> to vector<2x32xf32>
      %88 = arith.negf %87 : vector<2x32xf32>
      %89 = math.exp %88 : vector<2x32xf32>
      %cst_72 = arith.constant 1.000000e+00 : f32
      %90 = vector.broadcast %cst_72 : f32 to vector<2x32xf32>
      %91 = arith.addf %90, %89 : vector<2x32xf32>
      %92 = arith.divf %90, %91 : vector<2x32xf32>
      %93 = vector.extract_strided_slice %80 {offsets = [0, 64], sizes = [2, 32], strides = [1, 1]} : vector<2x128xf32> to vector<2x32xf32>
      %94 = math.tanh %93 : vector<2x32xf32>
      %95 = vector.extract_strided_slice %80 {offsets = [0, 96], sizes = [2, 32], strides = [1, 1]} : vector<2x128xf32> to vector<2x32xf32>
      %96 = arith.negf %95 : vector<2x32xf32>
      %97 = math.exp %96 : vector<2x32xf32>
      %cst_73 = arith.constant 1.000000e+00 : f32
      %98 = vector.broadcast %cst_73 : f32 to vector<2x32xf32>
      %99 = arith.addf %98, %97 : vector<2x32xf32>
      %100 = arith.divf %98, %99 : vector<2x32xf32>
      %101 = arith.mulf %92, %arg22 : vector<2x32xf32>
      %102 = arith.mulf %86, %94 : vector<2x32xf32>
      %103 = arith.addf %101, %102 : vector<2x32xf32>
      %104 = math.tanh %103 : vector<2x32xf32>
      %105 = arith.mulf %100, %104 : vector<2x32xf32>
      scf.yield %105, %103 : vector<2x32xf32>, vector<2x32xf32>
    }
    %c8_i32_10 = arith.constant 8 : i32
    %c0_11 = arith.constant 0 : index
    %c0_12 = arith.constant 0 : index
    %10 = vector.load %arg3[%c0_11, %c0_12] : memref<32x32xf32, #tpu.memory_space<vmem>>, vector<32x32xf32>
    %cst_13 = arith.constant dense<0.000000e+00> : vector<2x32xf32>
    %11 = tpu.matmul %4#0, %10, %cst_13 {dimension_numbers = #tpu.dot_dimension_numbers<[1], [0], [0], [1], [0, 0, 1, 1], [], []>} : vector<2x32xf32>, vector<32x32xf32>, vector<2x32xf32> -> vector<2x32xf32>
    %c0_14 = arith.constant 0 : index
    %c0_15 = arith.constant 0 : index
    %12 = vector.load %arg4[%c0_14, %c0_15] : memref<1x32xf32, #tpu.memory_space<vmem>>, vector<1x32xf32>
    %13 = vector.broadcast %12 : vector<1x32xf32> to vector<2x32xf32>
    %14 = arith.addf %11, %13 : vector<2x32xf32>
    %c0_16 = arith.constant 0 : index
    %c0_17 = arith.constant 0 : index
    %15 = vector.load %arg6[%c0_16, %c0_17] : memref<32x32xf32, #tpu.memory_space<vmem>>, vector<32x32xf32>
    %cst_18 = arith.constant dense<0.000000e+00> : vector<2x32xf32>
    %16 = tpu.matmul %9#0, %15, %cst_18 {dimension_numbers = #tpu.dot_dimension_numbers<[1], [0], [0], [1], [0, 0, 1, 1], [], []>} : vector<2x32xf32>, vector<32x32xf32>, vector<2x32xf32> -> vector<2x32xf32>
    %c0_19 = arith.constant 0 : index
    %c0_20 = arith.constant 0 : index
    %17 = vector.load %arg7[%c0_19, %c0_20] : memref<1x32xf32, #tpu.memory_space<vmem>>, vector<1x32xf32>
    %18 = vector.broadcast %17 : vector<1x32xf32> to vector<2x32xf32>
    %19 = arith.addf %16, %18 : vector<2x32xf32>
    %cst_21 = arith.constant 0.000000e+00 : f32
    %20 = vector.broadcast %cst_21 : f32 to vector<2x32xf32>
    %21 = arith.maximumf %14, %20 : vector<2x32xf32>
    %c0_22 = arith.constant 0 : index
    %c0_23 = arith.constant 0 : index
    %22 = vector.load %arg8[%c0_22, %c0_23] : memref<32x32xf32, #tpu.memory_space<vmem>>, vector<32x32xf32>
    %cst_24 = arith.constant dense<0.000000e+00> : vector<2x32xf32>
    %23 = tpu.matmul %21, %22, %cst_24 {dimension_numbers = #tpu.dot_dimension_numbers<[1], [0], [0], [1], [0, 0, 1, 1], [], []>} : vector<2x32xf32>, vector<32x32xf32>, vector<2x32xf32> -> vector<2x32xf32>
    %c0_25 = arith.constant 0 : index
    %c0_26 = arith.constant 0 : index
    %24 = vector.load %arg9[%c0_25, %c0_26] : memref<1x32xf32, #tpu.memory_space<vmem>>, vector<1x32xf32>
    %25 = vector.broadcast %24 : vector<1x32xf32> to vector<2x32xf32>
    %26 = arith.addf %23, %25 : vector<2x32xf32>
    %cst_27 = arith.constant 0.000000e+00 : f32
    %27 = vector.broadcast %cst_27 : f32 to vector<2x32xf32>
    %28 = arith.maximumf %26, %27 : vector<2x32xf32>
    %c0_28 = arith.constant 0 : index
    %c0_29 = arith.constant 0 : index
    %29 = vector.load %arg10[%c0_28, %c0_29] : memref<32x32xf32, #tpu.memory_space<vmem>>, vector<32x32xf32>
    %cst_30 = arith.constant dense<0.000000e+00> : vector<2x32xf32>
    %30 = tpu.matmul %28, %29, %cst_30 {dimension_numbers = #tpu.dot_dimension_numbers<[1], [0], [0], [1], [0, 0, 1, 1], [], []>} : vector<2x32xf32>, vector<32x32xf32>, vector<2x32xf32> -> vector<2x32xf32>
    %c0_31 = arith.constant 0 : index
    %c0_32 = arith.constant 0 : index
    %31 = vector.load %arg11[%c0_31, %c0_32] : memref<1x32xf32, #tpu.memory_space<vmem>>, vector<1x32xf32>
    %32 = vector.broadcast %31 : vector<1x32xf32> to vector<2x32xf32>
    %33 = arith.addf %30, %32 : vector<2x32xf32>
    %cst_33 = arith.constant 0.000000e+00 : f32
    %34 = vector.broadcast %cst_33 : f32 to vector<2x32xf32>
    %35 = arith.maximumf %19, %34 : vector<2x32xf32>
    %c0_34 = arith.constant 0 : index
    %c0_35 = arith.constant 0 : index
    %36 = vector.load %arg8[%c0_34, %c0_35] : memref<32x32xf32, #tpu.memory_space<vmem>>, vector<32x32xf32>
    %cst_36 = arith.constant dense<0.000000e+00> : vector<2x32xf32>
    %37 = tpu.matmul %35, %36, %cst_36 {dimension_numbers = #tpu.dot_dimension_numbers<[1], [0], [0], [1], [0, 0, 1, 1], [], []>} : vector<2x32xf32>, vector<32x32xf32>, vector<2x32xf32> -> vector<2x32xf32>
    %c0_37 = arith.constant 0 : index
    %c0_38 = arith.constant 0 : index
    %38 = vector.load %arg9[%c0_37, %c0_38] : memref<1x32xf32, #tpu.memory_space<vmem>>, vector<1x32xf32>
    %39 = vector.broadcast %38 : vector<1x32xf32> to vector<2x32xf32>
    %40 = arith.addf %37, %39 : vector<2x32xf32>
    %cst_39 = arith.constant 0.000000e+00 : f32
    %41 = vector.broadcast %cst_39 : f32 to vector<2x32xf32>
    %42 = arith.maximumf %40, %41 : vector<2x32xf32>
    %c0_40 = arith.constant 0 : index
    %c0_41 = arith.constant 0 : index
    %43 = vector.load %arg10[%c0_40, %c0_41] : memref<32x32xf32, #tpu.memory_space<vmem>>, vector<32x32xf32>
    %cst_42 = arith.constant dense<0.000000e+00> : vector<2x32xf32>
    %44 = tpu.matmul %42, %43, %cst_42 {dimension_numbers = #tpu.dot_dimension_numbers<[1], [0], [0], [1], [0, 0, 1, 1], [], []>} : vector<2x32xf32>, vector<32x32xf32>, vector<2x32xf32> -> vector<2x32xf32>
    %c0_43 = arith.constant 0 : index
    %c0_44 = arith.constant 0 : index
    %45 = vector.load %arg11[%c0_43, %c0_44] : memref<1x32xf32, #tpu.memory_space<vmem>>, vector<1x32xf32>
    %46 = vector.broadcast %45 : vector<1x32xf32> to vector<2x32xf32>
    %47 = arith.addf %44, %46 : vector<2x32xf32>
    %c0_45 = arith.constant 0 : index
    %c0_46 = arith.constant 0 : index
    %48 = vector.load %arg12[%c0_45, %c0_46] : memref<32x32xf32, #tpu.memory_space<vmem>>, vector<32x32xf32>
    %cst_47 = arith.constant dense<0.000000e+00> : vector<2x32xf32>
    %49 = tpu.matmul %47, %48, %cst_47 {dimension_numbers = #tpu.dot_dimension_numbers<[1], [0], [0], [1], [0, 0, 1, 1], [], []>} : vector<2x32xf32>, vector<32x32xf32>, vector<2x32xf32> -> vector<2x32xf32>
    %c0_48 = arith.constant 0 : index
    %c0_49 = arith.constant 0 : index
    %50 = vector.load %arg13[%c0_48, %c0_49] : memref<32x32xf32, #tpu.memory_space<vmem>>, vector<32x32xf32>
    %cst_50 = arith.constant dense<0.000000e+00> : vector<2x32xf32>
    %51 = tpu.matmul %33, %50, %cst_50 {dimension_numbers = #tpu.dot_dimension_numbers<[1], [0], [0], [1], [0, 0, 1, 1], [], []>} : vector<2x32xf32>, vector<32x32xf32>, vector<2x32xf32> -> vector<2x32xf32>
    %52 = arith.addf %49, %51 : vector<2x32xf32>
    %c0_51 = arith.constant 0 : index
    %c0_52 = arith.constant 0 : index
    %53 = vector.load %arg14[%c0_51, %c0_52] : memref<1x32xf32, #tpu.memory_space<vmem>>, vector<1x32xf32>
    %54 = vector.broadcast %53 : vector<1x32xf32> to vector<2x32xf32>
    %55 = arith.addf %52, %54 : vector<2x32xf32>
    %cst_53 = arith.constant 0.000000e+00 : f32
    %56 = vector.broadcast %cst_53 : f32 to vector<2x32xf32>
    %57 = arith.maximumf %55, %56 : vector<2x32xf32>
    %c0_54 = arith.constant 0 : index
    %c0_55 = arith.constant 0 : index
    %58 = vector.load %arg15[%c0_54, %c0_55] : memref<32x16xf32, #tpu.memory_space<vmem>>, vector<32x16xf32>
    %cst_56 = arith.constant dense<0.000000e+00> : vector<2x16xf32>
    %59 = tpu.matmul %57, %58, %cst_56 {dimension_numbers = #tpu.dot_dimension_numbers<[1], [0], [0], [1], [0, 0, 1, 1], [], []>} : vector<2x32xf32>, vector<32x16xf32>, vector<2x16xf32> -> vector<2x16xf32>
    %c0_57 = arith.constant 0 : index
    %c0_58 = arith.constant 0 : index
    %60 = vector.load %arg16[%c0_57, %c0_58] : memref<1x16xf32, #tpu.memory_space<vmem>>, vector<1x16xf32>
    %61 = vector.broadcast %60 : vector<1x16xf32> to vector<2x16xf32>
    %62 = arith.addf %59, %61 : vector<2x16xf32>
    %cst_59 = arith.constant 0.000000e+00 : f32
    %63 = vector.broadcast %cst_59 : f32 to vector<2x16xf32>
    %64 = arith.maximumf %62, %63 : vector<2x16xf32>
    %c0_60 = arith.constant 0 : index
    %c0_61 = arith.constant 0 : index
    %65 = vector.load %arg17[%c0_60, %c0_61] : memref<16x1xf32, #tpu.memory_space<vmem>>, vector<16x1xf32>
    %cst_62 = arith.constant dense<0.000000e+00> : vector<2x1xf32>
    %66 = tpu.matmul %64, %65, %cst_62 {dimension_numbers = #tpu.dot_dimension_numbers<[1], [0], [0], [1], [0, 0, 1, 1], [], []>} : vector<2x16xf32>, vector<16x1xf32>, vector<2x1xf32> -> vector<2x1xf32>
    %c0_63 = arith.constant 0 : index
    %c0_64 = arith.constant 0 : index
    %67 = vector.load %arg18[%c0_63, %c0_64] : memref<1x1xf32, #tpu.memory_space<vmem>>, vector<1x1xf32>
    %68 = vector.broadcast %67 : vector<1x1xf32> to vector<2x1xf32>
    %69 = arith.addf %66, %68 : vector<2x1xf32>
    %70 = arith.negf %69 : vector<2x1xf32>
    %71 = math.exp %70 : vector<2x1xf32>
    %cst_65 = arith.constant 1.000000e+00 : f32
    %72 = vector.broadcast %cst_65 : f32 to vector<2x1xf32>
    %73 = arith.addf %72, %71 : vector<2x1xf32>
    %74 = arith.divf %72, %73 : vector<2x1xf32>
    %c0_66 = arith.constant 0 : index
    %c0_67 = arith.constant 0 : index
    %75 = vector.load %arg19[%c0_66, %c0_67] : memref<2x1xf32, #tpu.memory_space<vmem>>, vector<2x1xf32>
    tpu.vector_store %arg19[%c0_66, %c0_67], %74 {strides = array<i32>} : memref<2x1xf32, #tpu.memory_space<vmem>>, vector<2x1xf32>,
    return
  }
}

</mosaic_0001>

<bundles_post_ra>
// kernel: model_forward_bce.3
= control target key start
LH: loop header
LB: loop body
LE: loop exit
PB: predicated region body
PF: predicated region fallthrough
CT: control target
= control target key end

     0   :  { %8 = vsyncpa [#allocation4], 0  ;;  %s157_s12 = smov [#allocation3]   ;;  %s197_s0 = inlined_call_operand.hbm [shape: f32[16,16], index: 0, kind: input, shape index: {}]   ;;  %s198_s1 = inlined_call_operand.vmem [shape: bf16[16,128], index: 1, kind: input, shape index: {}]   ;;  %s199_s2 = inlined_call_operand.vmem [shape: f32[1,128], index: 2, kind: input, shape index: {}]   ;;  %s200_s3 = inlined_call_operand.vmem [shape: f32[16,128], index: 3, kind: output, shape index: {}]  }
   0x1   :  { %s14_s13 = sshll.u32 %s157_s12, 4  ;;  %s15_s13 = int_to_ptr.vmem [resolvable:$true] %s14_s13 }
   0x2   :  { %s143_s14 = scalar_lea.vmem %s15_s13, 256  ;;  %p148_p1 = scmp.lt.s32.totalorder %s15_s13, %s15_s13 }
   0x3   :  { %p144_p0 = scmp.ne.s32.totalorder %s15_s13, %s143_s14  ;;  %p149_p2 = scmp.lt.s32.totalorder %s143_s14, %s143_s14 }
   0x5   :  { %p150_p3 = por %p149_p2, %p148_p1 }
   0x7   :  { %p151_p4 = pnand %p150_p3, %p144_p0 }
   0x9   :  { %154 = shalt.err (!%p151_p4)
}
   0xa   :  { %s158_s15 = smov 128   ;;  %s159_s16 = smov 8  }
   0xb   :  { %20 = dma.hbm_to_vmem [thread:$0]  %s197_s0, 256, %s15_s13, [#allocation4], %s158_s15, %s158_s15, %s159_s16  }
   0xc   :  { %155 = dma.done.wait [#allocation4], 256  }
   0xd   :  { %156 = vsyncadd [#allocation4], 4294967040  ;;  %v160_v0 = vmov 0.0   ;;  %vm161_vm0 = vmmov 0   ;;  %v134_v1 = vld [vmem:[%s198_s1] sm:$0xff]   ;;  %v38_v3 = vld [vmem:[#allocation3 + $0x8] sm:$0xff] }
   0xe   :  { %123 = vmatprep.subr.bf16.mxu0 %v160_v0  ;;  %125 = vmatprep.mubr.msk.bf16.mxu0 %vm161_vm0, %v160_v0  ;;  %v37_v2 = vld [vmem:[#allocation3] sm:$0xff]  ;;  %vm48_vm1 = vcmask 130048  }
   0xf   :  { %124 = vmatpush3.bf16.msra.mxu0 %v134_v1  ;;  %v39_v4 = vpack.c.bf16 %v38_v3, %v37_v2  ;;  %v120_v5 = vld [vmem:[%s199_s2] ss:$0 sm:$0xff] }
  0x12   :  { %126 = vmatmul.mubr.msk.bf16.vlgmr.msra.gmra.mxu0 %vm48_vm1, %v39_v4 }
  0xd2   :  { %v86_v6 = vpop.f32.mrf.mxu0 }
  0xd3   :  { %v109_v7 = vadd.f32 %v120_v5, %v86_v6 }
  0xd4   :  { %v127_v8 = vpop.f32.mrf.mxu0 }
  0xd5   :  { %111 = vst [vmem:[%s200_s3] sm:$0xff] %v109_v7 }
  0xd6   :  { %v89_v9 = vpop.f32.mrf.mxu0 }
  0xd7   :  { %v110_v10 = vadd.f32 %v120_v5, %v89_v9 }
  0xd8   :  { %v128_v11 = vpop.f32.mrf.mxu0 }
  0xd9   :  { %112 = vst [vmem:[%s200_s3 + $0x8] sm:$0xff] %v110_v10 }
  0xda   :  { %117 = vsyncpa [#allocation4], 1 }

// kernel: model_forward_bce.4
= control target key start
LH: loop header
LB: loop body
LE: loop exit
PB: predicated region body
PF: predicated region fallthrough
CT: control target
= control target key end

     0   :  { %v156_v0 = vmov 0.0   ;;  %vm157_vm0 = vmmov 0   ;;  %vm58_vm1 = vcmask 523264   ;;  %s205_s1 = inlined_call_operand.vmem [shape: bf16[64,128], index: 1, kind: input, shape index: {}]   ;;  %s206_s0 = inlined_call_operand.vmem [shape: f32[16,64], index: 0, kind: input, shape index: {}]   ;;  %s207_s2 = inlined_call_operand.vmem [shape: f32[1,128], index: 2, kind: input, shape index: {}]   ;;  %s208_s3 = inlined_call_operand.vmem [shape: f32[16,128], index: 3, kind: output, shape index: {}]  }
   0x1   :  { %138 = vmatprep.subr.bf16.mxu0 %v156_v0  ;;  %v152_v1 = vld [vmem:[%s205_s1 + $0x18] sm:$0xff]   ;;  %146 = vmatprep.mubr.msk.bf16.mxu0 %vm157_vm0, %v156_v0  ;;  %v153_v2 = vld [vmem:[%s205_s1 + $0x10] sm:$0xff]   ;;  %v154_v3 = vld [vmem:[%s205_s1 + $0x8] sm:$0xff]  }
   0x2   :  { %139 = vmatpush3.bf16.msra.mxu0 %v152_v1  ;;  %v155_v4 = vld [vmem:[%s205_s1] sm:$0xff]   ;;  %v24_v6 = vld [vmem:[%s206_s0 + $0x8] sm:$0xff] }
   0x3   :  { %140 = vmatprep.subr.bf16.mxu0 %v156_v0  ;;  %v23_v5 = vld [vmem:[%s206_s0] sm:$0xff] }
   0x4   :  { %v25_v7 = vpack.c.bf16 %v24_v6, %v23_v5  ;;  %v132_v8 = vld [vmem:[%s207_s2] ss:$0 sm:$0xff] }
   0x6   :  { %141 = vmatpush3.bf16.msra.mxu0 %v153_v2 }
   0x7   :  { %142 = vmatprep.subr.bf16.mxu0 %v156_v0 }
   0xa   :  { %143 = vmatpush3.bf16.msra.mxu0 %v154_v3 }
   0xb   :  { %144 = vmatprep.subr.bf16.mxu0 %v156_v0 }
   0xe   :  { %145 = vmatpush3.bf16.msra.mxu0 %v155_v4 }
  0x11   :  { %147 = vmatmul.mubr.msk.bf16.vlgmr.msra.gmra.mxu0 %vm58_vm1, %v25_v7 }
  0xd1   :  { %v96_v9 = vpop.f32.mrf.mxu0 }
  0xd2   :  { %v119_v10 = vadd.f32 %v132_v8, %v96_v9 }
  0xd3   :  { %v148_v11 = vpop.f32.mrf.mxu0 }
  0xd4   :  { %121 = vst [vmem:[%s208_s3] sm:$0xff] %v119_v10 }
  0xd5   :  { %v99_v12 = vpop.f32.mrf.mxu0 }
  0xd6   :  { %v120_v13 = vadd.f32 %v132_v8, %v99_v12 }
  0xd7   :  { %v149_v14 = vpop.f32.mrf.mxu0 }
  0xd8   :  { %122 = vst [vmem:[%s208_s3 + $0x8] sm:$0xff] %v120_v13 }

// kernel: model_forward_bce.5
= control target key start
LH: loop header
LB: loop body
LE: loop exit
PB: predicated region body
PF: predicated region fallthrough
CT: control target
= control target key end

     0   :  { %v1469_v5 = vmov 0.0   ;;  %v1473_v6 = vmov 0.0   ;;  %s1839_s0 = inlined_call_operand.vmem [shape: f32[8,2,128], index: 0, kind: input, shape index: {}]   ;;  %s1840_s1 = inlined_call_operand.vmem [shape: f32[8,2,128], index: 1, kind: input, shape index: {}]   ;;  %s1841_s2 = inlined_call_operand.vmem [shape: f32[32,128], index: 2, kind: input, shape index: {}]   ;;  %s1842_s3 = inlined_call_operand.vmem [shape: f32[32,32], index: 3, kind: input, shape index: {}]   ;;  %s1843_s4 = inlined_call_operand.vmem [shape: f32[1,32], index: 4, kind: input, shape index: {}]   ;;  %s1844_s5 = inlined_call_operand.vmem [shape: f32[32,128], index: 5, kind: input, shape index: {}]   ;;  %s1845_s6 = inlined_call_operand.vmem [shape: f32[32,32], index: 6, kind: input, shape index: {}]   ;;  %s1846_s7 = inlined_call_operand.vmem [shape: f32[1,32], index: 7, kind: input, shape index: {}]   ;;  %s1847_s8 = inlined_call_operand.vmem [shape: f32[32,32], index: 8, kind: input, shape index: {}]   ;;  %s1848_s9 = inlined_call_operand.vmem [shape: f32[1,32], index: 9, kind: input, shape index: {}]   ;;  %s1849_s10 = inlined_call_operand.vmem [shape: f32[32,32], index: 10, kind: input, shape index: {}]   ;;  %s1850_s11 = inlined_call_operand.vmem [shape: f32[1,32], index: 11, kind: input, shape index: {}]   ;;  %s1851_s12 = inlined_call_operand.vmem [shape: f32[32,32], index: 12, kind: input, shape index: {}]   ;;  %s1852_s13 = inlined_call_operand.vmem [shape: f32[32,32], index: 13, kind: input, shape index: {}]   ;;  %s1853_s14 = inlined_call_operand.vmem [shape: f32[1,32], index: 14, kind: input, shape index: {}]   ;;  %s1854_s15 = inlined_call_operand.vmem [shape: f32[32,16], index: 15, kind: input, shape index: {}]   ;;  %s1855_s16 = inlined_call_operand.vmem [shape: f32[1,16], index: 16, kind: input, shape index: {}]   ;;  %s1856_s17 = inlined_call_operand.vmem [shape: f32[16,1], index: 17, kind: input, shape index: {}]   ;;  %s1857_s18 = inlined_call_operand.<no memory space> [shape: f32[1,1], index: 18, kind: input, shape index: {}]   ;;  %s1858_s19 = inlined_call_operand.vmem [shape: f32[2,1], index: 19, kind: output, shape index: {}]  }
   0x1   :  { %1861 = sst [smem:[#allocation3_spill]] %s1839_s0  ;;  %v24_v0 = vstv %s1857_s18  ;;  %s1619_s18 = smov 0  }
   0x2   :  { %1862 = sst [smem:[#allocation4_spill]] %s1840_s1  ;;  %25 = vst [vmem:[#allocation2] sm:$0x1] %v24_v0 }
   0x3   :  { %1863 = sst [smem:[#allocation5_spill]] %s1841_s2 }
   0x4   :  { %1864 = sst [smem:[#allocation6_spill]] %s1842_s3 }
   0x5   :  { %s1865_s1 = sld [smem:[#allocation5_spill]] }
   0xb   :  { %v64_v1 = vld [vmem:[%s1865_s1] sm:$0xff]  ;;  %v65_v2 = vld [vmem:[%s1865_s1 + $0x8] sm:$0xff]  ;;  %v66_v3 = vld [vmem:[%s1865_s1 + $0x10] sm:$0xff] }
   0xc   :  { %v67_v4 = vld [vmem:[%s1865_s1 + $0x18] sm:$0xff] }
   0xd LB: > { %v1493_v7 = vmov 0.0   ;;  %vm1494_vm0 = vmmov 0   ;;  %s1495_s26 = smov 32   ;;  %vm82_vm1 = vcmask 261120   ;;  %s1156_s27 = sshll.u32 %s1479_s18, 1  ;;  %s1479_s18 = sphi %s1619_s18, %s73_s18   ;;  %v1475_v6 = vphi %v1473_v6, %v1474_v6   ;;  %v1471_v5 = vphi %v1469_v5, %v173_v5  }
   0xe   : > { %1238 = vmatprep.subr.mxu0 %v1493_v7  ;;  %1246 = vmatprep.mubr.msk.f32.mxu0 %vm1494_vm0, %v1493_v7  ;;  %s1866_s0 = sld [smem:[#allocation3_spill]]  ;;  %s1496_s20 = smov 64  }
   0xf   : > { %80 = vrot.lane.b32.xlu0 %v1475_v6, %s1495_s26  ;;  %1239 = vmatpush3.msra.mxu0 %v67_v4  ;;  %s73_s18 = sadd.s32 1, %s1479_s18  }
  0x10   : > { %1240 = vmatprep.subr.mxu0 %v1493_v7  ;;  %p70_p0 = scmp.ge.s32.totalorder %s73_s18, 8  }
  0x11   : > { %1241 = vmatpush3.msra.mxu0 %v66_v3  ;;  %v180_v25 = vld [vmem:[%s1844_s5] sm:$0xff] (%p70_p0)  ;;  %v181_v26 = vld [vmem:[%s1844_s5 + $0x8] sm:$0xff] (%p70_p0)  ;;  %v182_v27 = vld [vmem:[%s1844_s5 + $0x10] sm:$0xff] (%p70_p0)  ;;  %v1481_v29 = vmov (%p70_p0), 0.0   ;;  %v1485_v30 = vmov (%p70_p0), 0.0   ;;  %s1647_s18 = smov (%p70_p0), 0  }
  0x12   : > { %1242 = vmatprep.subr.mxu0 %v1493_v7  ;;  %v183_v28 = vld [vmem:[%s1844_s5 + $0x18] sm:$0xff] (%p70_p0) }
  0x13   : > { %1243 = vmatpush3.msra.mxu0 %v65_v2 }
  0x14   : > { %1244 = vmatprep.subr.mxu0 %v1493_v7  ;;  %s77_s30 = scalar_lea.vmem %s1866_s0, %s1156_s27 }
  0x15   : > { %1245 = vmatpush3.msra.mxu0 %v64_v1  ;;  %v78_v9 = vld [vmem:[%s77_s30] sm:$0x3] }
  0x81   : > { %v81_v8 = vpop.permute.xlu0 %80 }
  0x82   : > { %1247 = vmatmul.mubr.msk.f32.vlgmr.msra.gmra.mxu0 %vm82_vm1, %v81_v8 }
 0x142   : > { %v151_v10 = vpop.f32.mrf.mxu0 }
 0x143   : > { %v155_v11 = vadd.f32 %v151_v10, %v78_v9 }
 0x144   : > { %v1248_v12 = vpop.f32.mrf.mxu0 }
 0x145   : > { %1425 = vtanh.f32 %v155_v11  ;;  %v1158_v14 = vmul.f32 -1.442695, %v155_v11 }
 0x147   : > { %1427 = vpow2.f32 %v1158_v14 }
 0x152   : > { %v1426_v13 = vpop.eup %1425 }
 0x153   : > { %165 = vrot.lane.b32.xlu0 %v1426_v13, %s1496_s20 }
 0x154   : > { %v1428_v15 = vpop.eup %1427 }
 0x155   : > { %v159_v16 = vadd.f32 1.0, %v1428_v15 }
 0x157   : > { %1429 = vrcp.f32 %v159_v16 }
 0x164   : > { %v1430_v17 = vpop.eup %1429 }
 0x165   : > { %v163_v20 = vmul.f32 %v1471_v5, %v1430_v17 }
 0x1c5   : > { %v166_v18 = vpop.permute.xlu0 %165 }
 0x1c6   : > { %v168_v19 = vmul.f32 %v1430_v17, %v166_v18 }
 0x1c8   : > { %170 = vrot.lane.b32.xlu1 %v168_v19, %s1495_s26 }
 0x23a   : > { %v171_v21 = vpop.permute.xlu1 %170 }
 0x23b   : > { %v173_v5 = vadd.f32 %v171_v21, %v163_v20  }
 0x23d   : > { %1431 = vtanh.f32 %v173_v5 }
 0x24a   : > { %v1432_v22 = vpop.eup %1431 }
 0x24b   : > { %176 = vrot.lane.b32.xlu1 %v1432_v22, %s1496_s20 }
 0x2bd   : > { %v177_v23 = vpop.permute.xlu1 %176  ;;  %72 = sbr.rel (!%p70_p0) target bundleno = 13 (0xd), region = 112 }
 0x2be   : > { %v1629_v6 = vmul.f32 %v1430_v17, %v177_v23  }
 0x2c0   : > { %v1867_v24 = vmov %v1629_v6 }
 0x2c1   : > { %v1474_v6 = vmov %v1867_v24  }
 0x2c2 LB: > { %v1497_v31 = vmov 0.0   ;;  %vm1498_vm2 = vmmov 0   ;;  %s1499_s26 = smov 32   ;;  %s1159_s5 = sshll.u32 %s1491_s18, 1  ;;  %s1491_s18 = sphi %s1647_s18, %s189_s18   ;;  %v1487_v30 = vphi %v1485_v30, %v1486_v30   ;;  %v1483_v29 = vphi %v1481_v29, %v289_v29  }
 0x2c3   : > { %1249 = vmatprep.subr.mxu0 %v1497_v31  ;;  %1257 = vmatprep.mubr.msk.f32.mxu0 %vm1498_vm2, %v1497_v31  ;;  %s1868_s29 = sld [smem:[#allocation4_spill]]  ;;  %s1500_s30 = smov 64  }
 0x2c4   : > { %196 = vrot.lane.b32.xlu0 %v1487_v30, %s1499_s26  ;;  %1250 = vmatpush3.msra.mxu0 %v183_v28  ;;  %s189_s18 = sadd.s32 1, %s1491_s18  }
 0x2c5   : > { %1251 = vmatprep.subr.mxu0 %v1497_v31  ;;  %p186_p1 = scmp.ge.s32.totalorder %s189_s18, 8  }
 0x2c6   : > { %1252 = vmatpush3.msra.mxu0 %v182_v27  ;;  %s1869_s1 = sld [smem:[#allocation6_spill]] (%p186_p1)  ;;  %s1501_s22 = smov (%p186_p1), 32   ;;  %v1502_v50 = vmov (%p186_p1), 0.0   ;;  %v386_v52 = vld [vmem:[%s1845_s6 + $0x18] sm:$0xff] (%p186_p1)  ;;  %vm1503_vm3 = vmmov (%p186_p1), 0   ;;  %v385_v54 = vld [vmem:[%s1845_s6 + $0x10] sm:$0xff] (%p186_p1) }
 0x2c7   : > { %1253 = vmatprep.subr.mxu0 %v1497_v31  ;;  %1271 = vmatprep.subr.mxu1 (%p186_p1), %v1502_v50  ;;  %v384_v56 = vld [vmem:[%s1845_s6 + $0x8] sm:$0xff] (%p186_p1)  ;;  %v383_v57 = vld [vmem:[%s1845_s6] sm:$0xff] (%p186_p1)  ;;  %v473_v58 = vld [vmem:[%s1847_s8 + $0x18] sm:$0xff] (%p186_p1)  ;;  %vm1044_vm4 = vcmask (%p186_p1), 130048   ;;  %vm1124_vm5 = vcmask (%p186_p1), 1024  }
 0x2c8   : > { %1254 = vmatpush3.msra.mxu0 %v181_v26  ;;  %1272 = vmatpush3.msra.mxu1 (%p186_p1), %v386_v52  ;;  %v472_v60 = vld [vmem:[%s1847_s8 + $0x10] sm:$0xff] (%p186_p1)  ;;  %v471_v62 = vld [vmem:[%s1847_s8 + $0x8] sm:$0xff] (%p186_p1)  ;;  %v470_v63 = vld [vmem:[%s1847_s8] sm:$0xff] (%p186_p1) }
 0x2c9   : > { %1255 = vmatprep.subr.mxu0 %v1497_v31  ;;  %s193_s0 = scalar_lea.vmem %s1868_s29, %s1159_s5  ;;  %1273 = vmatprep.subr.mxu1 (%p186_p1), %v1502_v50  ;;  %v558_v0 = vld [vmem:[%s1849_s10 + $0x18] sm:$0xff] (%p186_p1)  ;;  %v557_v1 = vld [vmem:[%s1849_s10 + $0x10] sm:$0xff] (%p186_p1)  ;;  %v1162_v2 = vld [vmem:[%s1843_s4] ss:$0 sm:$0xff] (%p186_p1) }
 0x2ca   : > { %1256 = vmatpush3.msra.mxu0 %v180_v25  ;;  %v194_v33 = vld [vmem:[%s193_s0] sm:$0x3]  ;;  %1274 = vmatpush3.msra.mxu1 (%p186_p1), %v385_v54  ;;  %v556_v12 = vld [vmem:[%s1849_s10 + $0x8] sm:$0xff] (%p186_p1)  ;;  %v794_v14 = vld [vmem:[%s1852_s13 + $0x18] sm:$0xff] (%p186_p1) }
 0x2cb   :  { %1260 = vmatprep.subr.mxu0 (%p186_p1), %v1502_v50  ;;  %1275 = vmatprep.subr.mxu1 (%p186_p1), %v1502_v50  ;;  %v1164_v6 = vld [vmem:[%s1846_s7] ss:$0 sm:$0xff] (%p186_p1)  ;;  %v793_v15 = vld [vmem:[%s1852_s13 + $0x10] sm:$0xff] (%p186_p1)  ;;  %v792_v25 = vld [vmem:[%s1852_s13 + $0x8] sm:$0xff] (%p186_p1) }
 0x2cc   :  { %v299_v49 = vld [vmem:[%s1869_s1 + $0x18] sm:$0xff] (%p186_p1)  ;;  %v298_v51 = vld [vmem:[%s1869_s1 + $0x10] sm:$0xff] (%p186_p1)  ;;  %v297_v53 = vld [vmem:[%s1869_s1 + $0x8] sm:$0xff] (%p186_p1)  ;;  %1276 = vmatpush3.msra.mxu1 (%p186_p1), %v384_v56  ;;  %1279 = vmatprep.mubr.msk.f32.mxu1 (%p186_p1), %vm1503_vm3, %v1502_v50 }
 0x2cd   :  { %v296_v55 = vld [vmem:[%s1869_s1] sm:$0xff] (%p186_p1)  ;;  %1277 = vmatprep.subr.mxu1 (%p186_p1), %v1502_v50  ;;  %v790_v27 = vld [vmem:[%s1851_s12 + $0x18] sm:$0xff] (%p186_p1)  ;;  %v789_v28 = vld [vmem:[%s1851_s12 + $0x10] sm:$0xff] (%p186_p1) }
 0x2ce   :  { %1278 = vmatpush3.msra.mxu1 (%p186_p1), %v383_v57  ;;  %v555_v13 = vld [vmem:[%s1849_s10] sm:$0xff] (%p186_p1) }
 0x2cf   :  { %1293 = vmatprep.subr.mxu1 (%p186_p1), %v1502_v50  ;;  %v1166_v16 = vld [vmem:[%s1848_s9] ss:$0 sm:$0xff] (%p186_p1) }
 0x2d0   :  { %v791_v26 = vld [vmem:[%s1852_s13] sm:$0xff] (%p186_p1) }
 0x2d1   :  { %v1168_v31 = vld [vmem:[%s1850_s11] ss:$0 sm:$0xff] (%p186_p1) }
 0x2d2   :  { %v1035_v52 = vld [vmem:[%s1856_s17] sm:$0xff] (%p186_p1) }
 0x336   : > { %v197_v32 = vpop.permute.xlu0 %196 }
 0x337   : > { %1258 = vmatmul.mubr.msk.f32.vlgmr.msra.gmra.mxu0 %vm82_vm1, %v197_v32 }
 0x338   :  { %1261 = vmatpush3.msra.mxu0 (%p186_p1), %v299_v49  ;;  %1268 = vmatprep.mubr.msk.f32.mxu0 (%p186_p1), %vm1503_vm3, %v1502_v50 }
 0x339   :  { %1262 = vmatprep.subr.mxu0 (%p186_p1), %v1502_v50 }
 0x33a   :  { %1263 = vmatpush3.msra.mxu0 (%p186_p1), %v298_v51  ;;  %v1036_v51 = vld [vmem:[%s1856_s17 + $0x8] sm:$0xff] (%p186_p1) }
 0x33b   :  { %1264 = vmatprep.subr.mxu0 (%p186_p1), %v1502_v50 }
 0x33c   :  { %1265 = vmatpush3.msra.mxu0 (%p186_p1), %v297_v53  ;;  %v1175_v53 = vld [vmem:[%s1855_s16] ss:$0 sm:$0xff] (%p186_p1) }
 0x33d   :  { %1266 = vmatprep.subr.mxu0 (%p186_p1), %v1502_v50 }
 0x33e   :  { %1267 = vmatpush3.msra.mxu0 (%p186_p1), %v296_v55 }
 0x33f   :  { %1282 = vmatprep.subr.mxu0 (%p186_p1), %v1502_v50 }
 0x3f7   : > { %v267_v34 = vpop.f32.mrf.mxu0 }
 0x3f8   : > { %v271_v35 = vadd.f32 %v267_v34, %v194_v33 }
 0x3f9   : > { %v1259_v36 = vpop.f32.mrf.mxu0 }
 0x3fa   : > { %1433 = vtanh.f32 %v271_v35  ;;  %v1161_v38 = vmul.f32 -1.442695, %v271_v35 }
 0x3fc   : > { %1435 = vpow2.f32 %v1161_v38  ;;  %v953_v38 = vld [vmem:[%s1854_s15 + $0x18] sm:$0xff] (%p186_p1) }
 0x407   : > { %v1434_v37 = vpop.eup %1433 }
 0x408   : > { %281 = vrot.lane.b32.xlu0 %v1434_v37, %s1500_s30 }
 0x409   : > { %v1436_v39 = vpop.eup %1435 }
 0x40a   : > { %v275_v40 = vadd.f32 1.0, %v1436_v39  ;;  %v952_v39 = vld [vmem:[%s1854_s15 + $0x10] sm:$0xff] (%p186_p1) }
 0x40c   : > { %1437 = vrcp.f32 %v275_v40  ;;  %308 = vrot.lane.b32.xlu0 (%p186_p1), %v1867_v24, %s1501_s22  ;;  %v951_v40 = vld [vmem:[%s1854_s15 + $0x8] sm:$0xff] (%p186_p1) }
 0x419   : > { %v1438_v41 = vpop.eup %1437 }
 0x41a   : > { %v279_v44 = vmul.f32 %v1483_v29, %v1438_v41 }
 0x47a   : > { %v282_v42 = vpop.permute.xlu0 %281 }
 0x47b   : > { %v284_v43 = vmul.f32 %v1438_v41, %v282_v42 }
 0x47d   : > { %286 = vrot.lane.b32.xlu1 %v284_v43, %s1499_s26 }
 0x47e   :  { %v309_v59 = vpop.permute.xlu0 (%p186_p1), %308 }
 0x47f   :  { %1269 = vmatmul.mubr.msk.f32.vlgmr.msra.gmra.mxu0 (%p186_p1), %vm82_vm1, %v309_v59 }
 0x480   :  { %1283 = vmatpush3.msra.mxu0 (%p186_p1), %v473_v58  ;;  %1290 = vmatprep.mubr.msk.f32.mxu0 (%p186_p1), %vm1503_vm3, %v1502_v50 }
 0x481   :  { %1284 = vmatprep.subr.mxu0 (%p186_p1), %v1502_v50 }
 0x482   :  { %1285 = vmatpush3.msra.mxu0 (%p186_p1), %v472_v60 }
 0x483   :  { %1286 = vmatprep.subr.mxu0 (%p186_p1), %v1502_v50 }
 0x484   :  { %1287 = vmatpush3.msra.mxu0 (%p186_p1), %v471_v62 }
 0x485   :  { %1288 = vmatprep.subr.mxu0 (%p186_p1), %v1502_v50 }
 0x486   :  { %1289 = vmatpush3.msra.mxu0 (%p186_p1), %v470_v63 }
 0x487   :  { %1304 = vmatprep.subr.mxu0 (%p186_p1), %v1502_v50 }
 0x4ef   : > { %v287_v45 = vpop.permute.xlu1 %286 }
 0x4f0   : > { %v289_v29 = vadd.f32 %v287_v45, %v279_v44   ;;  %v1174_v45 = vld [vmem:[%s1853_s14] ss:$0 sm:$0xff] (%p186_p1) }
 0x4f2   : > { %1439 = vtanh.f32 %v289_v29  ;;  %v788_v29 = vld [vmem:[%s1851_s12 + $0x8] sm:$0xff] (%p186_p1) }
 0x4ff   : > { %v1440_v46 = vpop.eup %1439 }
 0x500   : > { %292 = vrot.lane.b32.xlu1 %v1440_v46, %s1500_s30 }
 0x53f   :  { %v379_v3 = vpop.f32.mrf.mxu0 (%p186_p1) }
 0x540   :  { %v380_v4 = vadd.f32 (%p186_p1), %v1162_v2, %v379_v3 }
 0x541   :  { %v1270_v5 = vpop.f32.mrf.mxu0 (%p186_p1) }
 0x542   :  { %v469_v7 = vmax.f32 (%p186_p1), %v380_v4, 0.0 }
 0x544   :  { %1291 = vmatmul.mubr.msk.f32.vlgmr.msra.gmra.mxu0 (%p186_p1), %vm82_vm1, %v469_v7 }
 0x545   :  { %1305 = vmatpush3.msra.mxu0 (%p186_p1), %v473_v58  ;;  %1312 = vmatprep.mubr.msk.f32.mxu0 (%p186_p1), %vm1503_vm3, %v1502_v50  ;;  %v1177_v58 = vld [vmem:[#allocation2] ss:$0 sm:$0xff] (%p186_p1) }
 0x546   :  { %1306 = vmatprep.subr.mxu0 (%p186_p1), %v1502_v50 }
 0x547   :  { %1307 = vmatpush3.msra.mxu0 (%p186_p1), %v472_v60 }
 0x548   :  { %1308 = vmatprep.subr.mxu0 (%p186_p1), %v1502_v50 }
 0x549   :  { %1309 = vmatpush3.msra.mxu0 (%p186_p1), %v471_v62 }
 0x54a   :  { %1310 = vmatprep.subr.mxu0 (%p186_p1), %v1502_v50 }
 0x54b   :  { %1311 = vmatpush3.msra.mxu0 (%p186_p1), %v470_v63 }
 0x54c   :  { %1326 = vmatprep.subr.mxu0 (%p186_p1), %v1502_v50 }
 0x571   :  { %188 = sbr.rel (!%p186_p1) target bundleno = 706 (0x2c2), region = 123 }
 0x572   : > { %v293_v47 = vpop.permute.xlu1 %292 }
 0x573   : > { %v295_v48 = vmul.f32 %v1438_v41, %v293_v47   ;;  %v950_v41 = vld [vmem:[%s1854_s15] sm:$0xff] (%p186_p1) }
 0x575   : > { %v1486_v30 = vmov %v295_v48   ;;  %395 = vrot.lane.b32.xlu0 (%p186_p1), %v295_v48, %s1501_s22 }
 0x576   :  { %v787_v30 = vld [vmem:[%s1851_s12] sm:$0xff] }
 0x5e7   :  { %v396_v61 = vpop.permute.xlu0 %395 }
 0x5e8   :  { %1280 = vmatmul.mubr.msk.f32.vlgmr.msra.gmra.mxu1 %vm82_vm1, %v396_v61 }
 0x5e9   :  { %1301 = vmatprep.mubr.msk.f32.mxu1 %vm1503_vm3, %v1502_v50  ;;  %1294 = vmatpush3.msra.mxu1 %v558_v0 }
 0x5ea   :  { %1295 = vmatprep.subr.mxu1 %v1502_v50 }
 0x5eb   :  { %1296 = vmatpush3.msra.mxu1 %v557_v1 }
 0x5ec   :  { %1297 = vmatprep.subr.mxu1 %v1502_v50 }
 0x5ed   :  { %1298 = vmatpush3.msra.mxu1 %v556_v12 }
 0x5ee   :  { %1299 = vmatprep.subr.mxu1 %v1502_v50 }
 0x5ef   :  { %1300 = vmatpush3.msra.mxu1 %v555_v13 }
 0x5f0   :  { %1315 = vmatprep.subr.mxu1 %v1502_v50 }
 0x604   :  { %v550_v17 = vpop.f32.mrf.mxu0 }
 0x605   :  { %v551_v18 = vadd.f32 %v1166_v16, %v550_v17 }
 0x606   :  { %v1292_v19 = vpop.f32.mrf.mxu0 }
 0x607   :  { %v554_v20 = vmax.f32 %v551_v18, 0.0 }
 0x609   :  { %1302 = vmatmul.mubr.msk.f32.vlgmr.msra.gmra.mxu1 %vm82_vm1, %v554_v20 }
 0x60a   :  { %1316 = vmatpush3.msra.mxu1 %v558_v0  ;;  %1323 = vmatprep.mubr.msk.f32.mxu1 %vm1503_vm3, %v1502_v50 }
 0x60b   :  { %1317 = vmatprep.subr.mxu1 %v1502_v50 }
 0x60c   :  { %1318 = vmatpush3.msra.mxu1 %v557_v1 }
 0x60d   :  { %1319 = vmatprep.subr.mxu1 %v1502_v50 }
 0x60e   :  { %1320 = vmatpush3.msra.mxu1 %v556_v12 }
 0x60f   :  { %1321 = vmatprep.subr.mxu1 %v1502_v50 }
 0x610   :  { %1322 = vmatpush3.msra.mxu1 %v555_v13 }
 0x611   :  { %1337 = vmatprep.subr.mxu1 %v1502_v50 }
 0x6a8   :  { %v465_v8 = vpop.f32.mrf.mxu1 }
 0x6a9   :  { %v466_v9 = vadd.f32 %v1164_v6, %v465_v8 }
 0x6aa   :  { %v1281_v10 = vpop.f32.mrf.mxu1 }
 0x6ab   :  { %v639_v11 = vmax.f32 %v466_v9, 0.0 }
 0x6ad   :  { %1313 = vmatmul.mubr.msk.f32.vlgmr.msra.gmra.mxu0 %vm82_vm1, %v639_v11 }
 0x6ae   :  { %1334 = vmatprep.mubr.msk.f32.mxu0 %vm1503_vm3, %v1502_v50  ;;  %1327 = vmatpush3.msra.mxu0 %v794_v14 }
 0x6af   :  { %1328 = vmatprep.subr.mxu0 %v1502_v50 }
 0x6b0   :  { %1329 = vmatpush3.msra.mxu0 %v793_v15 }
 0x6b1   :  { %1330 = vmatprep.subr.mxu0 %v1502_v50 }
 0x6b2   :  { %1331 = vmatpush3.msra.mxu0 %v792_v25 }
 0x6b3   :  { %1332 = vmatprep.subr.mxu0 %v1502_v50 }
 0x6b4   :  { %1333 = vmatpush3.msra.mxu0 %v791_v26 }
 0x6b5   :  { %1348 = vmatprep.subr.mxu0 %v1502_v50 }
 0x6c9   :  { %v635_v32 = vpop.f32.mrf.mxu1 }
 0x6ca   :  { %v636_v33 = vadd.f32 %v1168_v31, %v635_v32 }
 0x6cb   :  { %v1303_v34 = vpop.f32.mrf.mxu1 }
 0x6cc   :  { %1335 = vmatmul.mubr.msk.f32.vlgmr.msra.gmra.mxu0 %vm82_vm1, %v636_v33 }
 0x6cd   :  { %1356 = vmatprep.mubr.msk.f32.mxu0 %vm1503_vm3, %v1502_v50  ;;  %1349 = vmatpush3.msra.mxu0 %v953_v38 }
 0x6ce   :  { %1350 = vmatprep.subr.mxu0 %v1502_v50 }
 0x6cf   :  { %1351 = vmatpush3.msra.mxu0 %v952_v39 }
 0x6d0   :  { %1352 = vmatprep.subr.mxu0 %v1502_v50 }
 0x6d1   :  { %1353 = vmatpush3.msra.mxu0 %v951_v40 }
 0x6d2   :  { %1354 = vmatprep.subr.mxu0 %v1502_v50 }
 0x6d3   :  { %1355 = vmatpush3.msra.mxu0 %v950_v41 }
 0x76d   :  { %v709_v21 = vpop.f32.mrf.mxu0 }
 0x76e   :  { %v710_v22 = vadd.f32 %v1166_v16, %v709_v21 }
 0x76f   :  { %v1314_v23 = vpop.f32.mrf.mxu0 }
 0x770   :  { %v713_v24 = vmax.f32 %v710_v22, 0.0 }
 0x772   :  { %1324 = vmatmul.mubr.msk.f32.vlgmr.msra.gmra.mxu1 %vm82_vm1, %v713_v24 }
 0x773   :  { %1345 = vmatprep.mubr.msk.f32.mxu1 %vm1503_vm3, %v1502_v50  ;;  %1338 = vmatpush3.msra.mxu1 %v790_v27 }
 0x774   :  { %1339 = vmatprep.subr.mxu1 %v1502_v50 }
 0x775   :  { %1340 = vmatpush3.msra.mxu1 %v789_v28 }
 0x776   :  { %1341 = vmatprep.subr.mxu1 %v1502_v50 }
 0x777   :  { %1342 = vmatpush3.msra.mxu1 %v788_v29 }
 0x778   :  { %1343 = vmatprep.subr.mxu1 %v1502_v50 }
 0x779   :  { %1344 = vmatpush3.msra.mxu1 %v787_v30 }
 0x77a   :  { %1359 = vmatprep.subr.mxu1 %v1502_v50 }
 0x78c   :  { %v864_v42 = vpop.f32.mrf.mxu0 }
 0x78e   :  { %v1336_v43 = vpop.f32.mrf.mxu0 }
 0x832   :  { %v783_v35 = vpop.f32.mrf.mxu1 }
 0x833   :  { %v784_v36 = vadd.f32 %v1168_v31, %v783_v35 }
 0x834   :  { %v1325_v37 = vpop.f32.mrf.mxu1 }
 0x835   :  { %1346 = vmatmul.mubr.msk.f32.vlgmr.msra.gmra.mxu1 %vm82_vm1, %v784_v36 }
 0x836   :  { %1363 = vmatprep.mubr.msk.f32.mxu1 %vm1503_vm3, %v1502_v50  ;;  %1360 = vmatpush3.msra.mxu1 %v1036_v51 }
 0x837   :  { %1361 = vmatprep.subr.mxu1 %v1502_v50 }
 0x838   :  { %1362 = vmatpush3.msra.mxu1 %v1035_v52 }
 0x8f5   :  { %v937_v44 = vpop.f32.mrf.mxu1 }
 0x8f6   :  { %v938_v46 = vadd.f32 %v937_v44, %v864_v42 }
 0x8f7   :  { %v1347_v47 = vpop.f32.mrf.mxu1 }
 0x8f8   :  { %v948_v48 = vadd.f32 %v1174_v45, %v938_v46 }
 0x8fa   :  { %v949_v49 = vmax.f32 %v948_v48, 0.0 }
 0x8fc   :  { %1357 = vmatmul.mubr.msk.f32.vlgmr.msra.gmra.mxu0 %vm82_vm1, %v949_v49 }
 0x9bc   :  { %v1030_v54 = vpop.f32.mrf.mxu0 }
 0x9bd   :  { %v1031_v55 = vadd.f32 %v1175_v53, %v1030_v54 }
 0x9be   :  { %v1358_v56 = vpop.f32.mrf.mxu0 }
 0x9bf   :  { %v1034_v57 = vmax.f32 %v1031_v55, 0.0 }
 0x9c1   :  { %1364 = vmatmul.mubr.msk.f32.vlgmr.msra.gmra.mxu1 %vm1044_vm4, %v1034_v57 }
 0xa81   :  { %v1114_v59 = vpop.f32.mrf.mxu1 }
 0xa82   :  { %v1115_v60 = vadd.f32 %v1177_v58, %v1114_v59 }
 0xa83   :  { %v1365_v61 = vpop.f32.mrf.mxu1 }
 0xa84   :  { %v1179_v50 = vmul.f32 -1.442695, %v1115_v60 }
 0xa86   :  { %1441 = vpow2.f32 %v1179_v50 }
 0xa93   :  { %v1442_v62 = vpop.eup %1441 }
 0xa94   :  { %v1121_v63 = vadd.f32 1.0, %v1442_v62 }
 0xa96   :  { %1443 = vrcp.f32 %v1121_v63 }
 0xaa3   :  { %v1444_v0 = vpop.eup %1443 }
 0xaa4   :  { %1125 = vst.msk [vmem:[%s1858_s19] sm:$0x3] %vm1124_vm5, %v1444_v0 }

</bundles_post_ra>
